<compile_context>
chip_gen: v5e
topology: v5e:2x2
jax: 0.10.0
libtpu: 0.0.40
codegen_flags: <defaults>
</compile_context>

<pallas_src>
import jax
import jax.numpy as jnp
from jax.experimental import pallas as pl
from jax.experimental.pallas import tpu as pltpu


def _round_up(x: int, m: int) -> int:
    return ((x + m - 1) // m) * m


def _radial_embedding_kernel(er_ref, s_ref, o_ref):
    # er_ref: VMEM (BR, pack+1)      exp(-r) for `pack` edges per dense row + a ones column
    # s_ref:  VMEM (pack+1, lane_w)  sqrt(beta) * [one-hot edge->lane expansion ; -mu row]
    # o_ref:  VMEM (BR, lane_w)      lane-dense output tile
    #
    # d[:, l] = sqrt(beta) * (exp(-r)[:, l // K] - mu[l % K])
    d = jnp.dot(
        er_ref[...],
        s_ref[...],
        preferred_element_type=jnp.float32,
        precision=jax.lax.Precision.HIGHEST,
    )
    o_ref[...] = jnp.exp(-(d * d)).astype(o_ref.dtype)


def radial_embedding(r_ji, mu_k, beta_k, *, block_rows=1024, out_dtype=None):
    """Pallas TPU forward of RadialEmbedding.  r_ji: (E, 1) -> (E, K)."""
    E, one = r_ji.shape
    assert one == 1
    K = int(mu_k.shape[-1])
    out_dtype = r_ji.dtype if out_dtype is None else out_dtype

    # Pack several edges per dense output row (target 512 lanes) when K
    # divides 128.  Otherwise fall back to pack=1 (K not a divisor of 128 ->
    # masked stores; correct but a perf cliff).
    LANE_TARGET = 512
    if K % 128 == 0:
        pack = 1                       # already lane-dense
    elif 128 % K == 0:
        pack = max(1, LANE_TARGET // K)
    else:
        pack = 1                       # lane-sparse fallback
    lane_w = pack * K

    rows = -(-E // pack)               # dense rows needed
    # Keep sublane alignment and force >= 2 grid steps when possible so v7x
    # can shard the E-blocks across its two TensorCores.
    block_rows = max(8, min(block_rows, _round_up(-(-rows // 2), 8)))
    rows_pad = _round_up(rows, block_rows)
    e_pad = rows_pad * pack

    r_flat = r_ji.reshape(-1).astype(jnp.float32)
    if e_pad != E:
        r_flat = jnp.pad(r_flat, (0, e_pad - E))   # exp(0)=1 -> finite, sliced off below

    # Hoist the per-edge exp(-r) out of the kernel (lane-dense here; inside
    # the kernel the narrow tile is lane-padded, so exp there would cost the
    # same EUP work as the full-width outer exp).
    er = jnp.exp(-r_flat).reshape(rows_pad, pack)
    er2 = jnp.concatenate([er, jnp.ones((rows_pad, 1), jnp.float32)], axis=1)

    # Constant expansion matrix S (resident in VMEM across all grid steps):
    #   (er2 @ S)[:, l] = sqrt(beta) * (er[:, l // K] - mu[l % K])
    sb = jnp.sqrt(beta_k.reshape(()).astype(jnp.float32))
    lane = jnp.arange(lane_w)
    onehot = (jnp.arange(pack)[:, None] == (lane // K)[None, :]).astype(jnp.float32)
    mu_row = -mu_k.reshape(-1).astype(jnp.float32)[lane % K][None, :]
    s_mat = sb * jnp.concatenate([onehot, mu_row], axis=0)        # (pack+1, lane_w)

    grid = (rows_pad // block_rows,)
    out_dense = pl.pallas_call(
        _radial_embedding_kernel,
        out_shape=jax.ShapeDtypeStruct((rows_pad, lane_w), out_dtype),
        grid=grid,
        in_specs=[
            pl.BlockSpec((block_rows, pack + 1), lambda i: (i, 0)),  # er2 (lane-padded)
            pl.BlockSpec((pack + 1, lane_w), lambda i: (0, 0)),      # S, resident
        ],
        out_specs=pl.BlockSpec((block_rows, lane_w), lambda i: (i, 0)),
        compiler_params=pltpu.CompilerParams(
            dimension_semantics=("parallel",),
        ),
    )(er2, s_mat)

    out = out_dense.reshape(e_pad, K)
    if e_pad != E:
        out = out[:E]
    return out


def make_params(num_radial: int, cut_off: float):
    # Deterministic buffer construction, matching the PyTorch __init__.
    exp_neg_cutoff = jnp.exp(-jnp.asarray(cut_off, dtype=jnp.float32))
    mu_k = jnp.linspace(exp_neg_cutoff, 1.0, num_radial, dtype=jnp.float32)
    mu_k = mu_k[None, :]                                           # (1, K)
    beta_k = (2.0 / num_radial * (1.0 - exp_neg_cutoff)) ** (-2)
    beta_k = jnp.asarray(beta_k, dtype=jnp.float32).reshape(1)     # (1,)
    return mu_k, beta_k


def radial_embedding_ref(r_ji, mu_k, beta_k):
    # Pure-JAX reference (mirrors the PyTorch forward exactly).
    return jnp.exp(-beta_k * (jnp.exp(-r_ji) - mu_k) ** 2)


if __name__ == "__main__":
    num_radial = 32
    cut_off = 5.0

    mu_k, beta_k = make_params(num_radial, cut_off)

    key0, key1 = jax.random.split(jax.random.PRNGKey(0))

    # Main case: E divisible by the edge pack.
    num_edges = 2048
    r_ji = jax.random.uniform(
        key0, (num_edges, 1), dtype=jnp.float32, minval=0.0, maxval=cut_off
    )
    out = jax.block_until_ready(radial_embedding(r_ji, mu_k, beta_k))
    ref = radial_embedding_ref(r_ji, mu_k, beta_k)
    assert out.shape == (num_edges, num_radial)
    assert jnp.allclose(out, ref, atol=1e-5, rtol=1e-5), "mismatch vs reference"

    # Ragged edge count (exercises the padding / slicing path).
    num_edges2 = 300
    r_ji2 = jax.random.uniform(
        key1, (num_edges2, 1), dtype=jnp.float32, minval=0.0, maxval=cut_off
    )
    out2 = jax.block_until_ready(radial_embedding(r_ji2, mu_k, beta_k))
    ref2 = radial_embedding_ref(r_ji2, mu_k, beta_k)
    assert out2.shape == (num_edges2, num_radial)
    assert jnp.allclose(out2, ref2, atol=1e-5, rtol=1e-5), "mismatch vs reference"

    # bf16 output path (halves the stored bytes on this write-bound kernel);
    # looser tolerance is the expected precision loss, not a bug.
    out_bf16 = jax.block_until_ready(
        radial_embedding(r_ji, mu_k, beta_k, out_dtype=jnp.bfloat16)
    )
    assert out_bf16.dtype == jnp.bfloat16
    assert jnp.allclose(out_bf16.astype(jnp.float32), ref, atol=1e-2, rtol=1e-2)

    print("KERNEL_OK")
</pallas_src>

<mosaic_0001>
module attributes {stable_mosaic.version = 11 : i64} {
  func.func @_radial_embedding_kernel(%arg0: i32, %arg1: memref<64x17xf32, #tpu.memory_space<vmem>>, %arg2: memref<17x512xf32, #tpu.memory_space<vmem>>, %arg3: memref<64x512xf32, #tpu.memory_space<vmem>>) attributes {dimension_semantics = [#tpu.dimension_semantics<parallel>], iteration_bounds = array<i64: 2>, scalar_prefetch = 0 : i64, scratch_operands = 0 : i64, tpu.core_type = #tpu.core_type<tc>, window_params = [{transform_indices = @transform_0, window_bounds = array<i64: 64, 17>}, {pipeline_mode = #tpu.pipeline_mode<synchronous>, transform_indices = @transform_1, window_bounds = array<i64: 17, 512>}, {transform_indices = @transform_2, window_bounds = array<i64: 64, 512>}]} {
    %c0 = arith.constant 0 : index
    %c0_0 = arith.constant 0 : index
    %0 = vector.load %arg1[%c0, %c0_0] : memref<64x17xf32, #tpu.memory_space<vmem>>, vector<64x17xf32>
    %c0_1 = arith.constant 0 : index
    %c0_2 = arith.constant 0 : index
    %1 = vector.load %arg2[%c0_1, %c0_2] : memref<17x512xf32, #tpu.memory_space<vmem>>, vector<17x512xf32>
    %cst = arith.constant dense<0.000000e+00> : vector<64x512xf32>
    %2 = tpu.matmul %0, %1, %cst {dimension_numbers = #tpu.dot_dimension_numbers<[1], [0], [0], [1], [0, 0, 1, 1], [], []>, precision = #tpu.contract_precision<fp32>} : vector<64x17xf32>, vector<17x512xf32>, vector<64x512xf32> -> vector<64x512xf32>
    %3 = arith.mulf %2, %2 : vector<64x512xf32>
    %cst_3 = arith.constant 0.000000e+00 : f32
    %4 = vector.broadcast %cst_3 : f32 to vector<64x512xf32>
    %5 = arith.subf %4, %3 : vector<64x512xf32>
    %6 = math.exp %5 : vector<64x512xf32>
    %c0_4 = arith.constant 0 : index
    %c0_5 = arith.constant 0 : index
    %7 = vector.load %arg3[%c0_4, %c0_5] : memref<64x512xf32, #tpu.memory_space<vmem>>, vector<64x512xf32>
    tpu.vector_store %arg3[%c0_4, %c0_5], %6 {strides = array<i32>} : memref<64x512xf32, #tpu.memory_space<vmem>>, vector<64x512xf32>,
    return
  }
  func.func @transform_0(%arg0: i32) -> (i32, i32) {
    %c0_i32 = arith.constant 0 : i32
    %c0_i32_0 = arith.constant 0 : i32
    return %arg0, %c0_i32 : i32, i32
  }
  func.func @transform_1(%arg0: i32) -> (i32, i32) {
    %c0_i32 = arith.constant 0 : i32
    %c0_i32_0 = arith.constant 0 : i32
    %c0_i32_1 = arith.constant 0 : i32
    return %c0_i32, %c0_i32_0 : i32, i32
  }
  func.func @transform_2(%arg0: i32) -> (i32, i32) {
    %c0_i32 = arith.constant 0 : i32
    %c0_i32_0 = arith.constant 0 : i32
    return %arg0, %c0_i32 : i32, i32
  }
}

</mosaic_0001>

<bundles_post_ra>
// kernel: tpu_custom_call.1
= control target key start
LH: loop header
LB: loop body
LE: loop exit
PB: predicated region body
PF: predicated region fallthrough
CT: control target
= control target key end

     0   :  { %7 = vsyncpa [#allocation3], 0  ;;  %s3010_s0 = inlined_call_operand.vmem [shape: f32[128,17], index: 0, kind: input, shape index: {}]   ;;  %s3011_s1 = inlined_call_operand.vmem [shape: f32[17,512], index: 1, kind: input, shape index: {}]   ;;  %s3012_s2 = inlined_call_operand.hbm [shape: f32[128,512], index: 2, kind: output, shape index: {}]  }
   0x1   :  { %9 = vsyncpa [#allocation3 + $0x1], 0  ;;  %s2199_s9 = smov 0   ;;  %s2201_s10 = smov 0  }
   0x2   :  { %s2203_s11 = smov 0   ;;  %s2205_s12 = smov 0  }
   0x3 LB: > { %s2220_s13 = sadd.s32 4294967295, %s2180_s12   ;;  %s1998_s14 = sadd.s32 4294967294, %s2180_s12   ;;  %s2180_s12 = sphi %s2205_s12, %s3058_s12   ;;  %s2176_s11 = sphi %s2203_s11, %s3057_s11   ;;  %s2172_s10 = sphi %s2201_s10, %s3056_s10   ;;  %s2168_s9 = sphi %s2199_s9, %s3055_s9  }
   0x4   : > { %s2224_s15 = sadd.s32 1, %s2180_s12   ;;  %s69_s16 = sadd.s32 1, %s2176_s11 }
   0x5   : > { %s66_s17 = ssub.s32 %s2180_s12, %s2224_s15  ;;  %p79_p0 = scmp.ne.s32.totalorder %s2176_s11, %s2172_s10 }
   0x6   : > { %p67_p1 = scmp.eq.s32.totalorder %s66_s17, 0  ;;  %p80_p2 = scmp.eq.s32.totalorder %s2220_s13, 1 }
   0x7   : > { %p85_p3 = scmp.ne.s32.totalorder %s2172_s10, %s2168_s9  ;;  %p86_p4 = scmp.eq.s32.totalorder %s1998_s14, 1 }
   0x8   : > { %s2235_s18 = scalar_select %p67_p1, %s2176_s11, %s69_s16  }
   0x9   : > { %p2237_p5 = por %p80_p2, %p79_p0  ;;  %p2241_p6 = por %p86_p4, %p85_p3 }
   0xa   : > { %p2001_p7 = scmp.ge.s32.totalorder %s2180_s12, 1  ;;  %p116_p8 = scmp.lt.s32.totalorder %s2180_s12, 3 }
   0xc   : > { %p117_p9 = pnand %p2001_p7, %p116_p8 }
   0xe   : > { %120 = sbr.rel (%p117_p9) target bundleno = 564 (0x234), region = 28 }
  0x13   : > { %v161_v0 = vld [vmem:[%s3011_s1 + $0x40] sm:$0x1]  ;;  %vm190_vm0 = vcmask 1040384   ;;  %s2003_s27 = sshll.u32 %s2220_s13, 3  ;;  %v162_v7 = vld [vmem:[%s3011_s1 + $0x48] sm:$0x1] }
  0x14   : > { %v157_v1 = vld [vmem:[%s3011_s1 + $0x20] sm:$0xff]  ;;  %v192_v3 = vsel %vm190_vm0, %v161_v0, 0  ;;  %p139_p10 = scmp.lt.s32.totalorder %s2003_s27, 15  ;;  %v195_v10 = vsel %vm190_vm0, %v162_v7, 0  ;;  %vm165_vm1 = vcmask 138240   ;;  %v158_v15 = vld [vmem:[%s3011_s1 + $0x28] sm:$0xff] }
  0x15   : > { %v153_v2 = vld [vmem:[%s3011_s1] sm:$0xff]  ;;  %v2258_v4 = vand.u32 4294901760, %v157_v1  ;;  %v2262_v6 = vand.u32 4294901760, %v192_v3  ;;  %v2273_v12 = vand.u32 4294901760, %v195_v10  ;;  %v2290_v22 = vand.u32 4294901760, %v158_v15  ;;  %v154_v57 = vld [vmem:[%s3011_s1 + $0x8] sm:$0xff] }
  0x16   : > { %v2260_v5 = vand.u32 4294901760, %v153_v2  ;;  %s3060_s27 = smov (!%p139_p10, %s2003_s27), 15  ;;  %v609_v59 = vand.u32 4294901760, %v154_v57  ;;  %s135_s29 = sand.u32 1, %s2172_s10  }
  0x17   : > { %v307_v8 = vsub.f32 %v157_v1, %v2258_v4  ;;  %v301_v11 = vsub.f32 %v192_v3, %v2262_v6  ;;  %428 = vmatpush.msra.mxu3 %v2262_v6  ;;  %217 = vmatpush.msra.mxu0 %v2262_v6  ;;  %s2004_s30 = sshll.u32 %s3060_s27, 3  ;;  %v2285_v17 = vsub.f32 %v195_v10, %v2273_v12  ;;  %s2012_s6 = sshll.u32 %s2220_s13, 8 }
  0x18   : > { %v313_v9 = vsub.f32 %v153_v2, %v2260_v5  ;;  %s2282_s7 = scalar_lea.vmem %s3010_s0, %s2004_s30  ;;  %v696_v38 = vsub.f32 %v158_v15, %v2290_v22  ;;  %v702_v60 = vsub.f32 %v154_v57, %v609_v59  ;;  %s2002_s30 = sshll.u32 %s135_s29, 8 }
  0x19   : > { %v308_v13 = vand.u32 4294901760, %v307_v8  ;;  %366 = vmatpush.msra.mxu2 %v301_v11  ;;  %v302_v16 = vand.u32 4294901760, %v301_v11  ;;  %430 = vmatpush.msra.mxu3 %v2258_v4  ;;  %v145_v18 = vld [vmem:[%s2282_s7] sm:$0xff]  ;;  %v146_v21 = vld [vmem:[%s2282_s7 + $0x8] sm:$0xff]  ;;  %v691_v25 = vand.u32 4294901760, %v2285_v17  ;;  %v147_v29 = vld [vmem:[%s2282_s7 + $0x10] sm:$0xff]  ;;  %s1932_s14 = scalar_lea.hbm %s3012_s2, %s2012_s6 }
  0x1a   : > { %v314_v14 = vand.u32 4294901760, %v313_v9  ;;  %219 = vmatpush.msra.mxu0 %v2258_v4  ;;  %v167_v24 = vsel %vm165_vm1, %v145_v18, 0  ;;  %v170_v26 = vsel %vm165_vm1, %v146_v21, 0  ;;  %v173_v37 = vsel %vm165_vm1, %v147_v29, 0  ;;  %v148_v46 = vld [vmem:[%s2282_s7 + $0x18] sm:$0xff]  ;;  %v149_v54 = vld [vmem:[%s2282_s7 + $0x20] sm:$0xff] }
  0x1b   : > { %v309_v19 = vsub.f32 %v307_v8, %v308_v13  ;;  %369 = vmatpush.msra.mxu2 %v307_v8  ;;  %v303_v23 = vsub.f32 %v301_v11, %v302_v16  ;;  %432 = vmatpush.msra.mxu3 %v2260_v5  ;;  %v2296_v27 = vand.u32 4294901760, %v167_v24  ;;  %v2299_v28 = vand.u32 4294901760, %v170_v26  ;;  %v150_v1 = vld [vmem:[%s2282_s7 + $0x28] sm:$0xff]  ;;  %v151_v10 = vld [vmem:[%s2282_s7 + $0x30] sm:$0xff]  ;;  %s2662_s3 = scalar_lea.vmem [#allocation2], %s2002_s30  ;;  %s1935_s17 = sshll.u32 %s1932_s14, 4  ;;  %s1936_s17 = int_to_ptr.hbm [resolvable:$true] %s1935_s17 }
  0x1c   : > { %v315_v20 = vsub.f32 %v313_v9, %v314_v14  ;;  %221 = vmatpush.msra.mxu0 %v2260_v5  ;;  %v692_v32 = vsub.f32 %v2285_v17, %v691_v25  ;;  %v697_v40 = vand.u32 4294901760, %v696_v38  ;;  %v2324_v43 = vand.u32 4294901760, %v173_v37  ;;  %s1933_s16 = sshll.u32 %s2662_s3, 4  ;;  %s1920_s21 = scalar_lea.sflag [#allocation3], %s135_s29  ;;  %s1934_s16 = int_to_ptr.vmem [resolvable:$true] %s1933_s16 }
  0x1d   : > { %v304_v30 = vand.u32 4294901760, %v303_v23  ;;  %372 = vmatpush.msra.mxu2 %v313_v9  ;;  %v310_v31 = vand.u32 4294901760, %v309_v19  ;;  %v2306_v33 = vsub.f32 %v167_v24, %v2296_v27  ;;  %v2310_v34 = vsub.f32 %v170_v26, %v2299_v28  ;;  %s2132_s22 = sshra.s32 %s1936_s17, 4  ;;  %s2138_s25 = scalar_lea.hbm %s3012_s2, 512  ;;  %s2133_s22 = int_to_ptr.hbm [resolvable:$true] %s2132_s22 }
  0x1e   : > { %498 = vmatpush.msrb.mxu0 %v302_v16  ;;  %v316_v35 = vand.u32 4294901760, %v315_v20  ;;  %v693_v36 = vand.u32 4294901760, %v692_v32  ;;  %v698_v44 = vsub.f32 %v696_v38, %v697_v40  ;;  %v2336_v49 = vsub.f32 %v173_v37, %v2324_v43  ;;  %v163_v32 = vld [vmem:[%s3011_s1 + $0x50] sm:$0x1]  ;;  %s2134_s13 = scalar_lea.hbm %s2133_s22, 256  ;;  %p2139_p0 = scmp.lt.s32.totalorder %s2133_s22, %s3012_s2 }
  0x1f   : > { %606 = vmatpush.msrb.mxu2 %v2273_v12  ;;  %3030 = vst [vmem:[#allocation5_spill] sm:$0xff] %v2310_v34  ;;  %305 = vmatpush.msra.mxu1 %v304_v30  ;;  %v2316_v39 = vand.u32 4294901760, %v2306_v33  ;;  %v2322_v42 = vand.u32 4294901760, %v2310_v34  ;;  %v176_v50 = vsel %vm165_vm1, %v148_v46, 0  ;;  %v179_v58 = vsel %vm165_vm1, %v149_v54, 0  ;;  %p2135_p11 = scmp.ne.s32.totalorder %s2133_s22, %s2134_s13  ;;  %p2140_p1 = scmp.lt.s32.totalorder %s2138_s25, %s2134_s13 }
  0x20   : > { %502 = vmatpush.msrb.mxu0 %v308_v13  ;;  %375 = vmatmul.f32.vlgmr.msra.gmra.mxu2 %v2306_v33  ;;  %v699_v47 = vand.u32 4294901760, %v698_v44  ;;  %v2347_v52 = vand.u32 4294901760, %v2336_v49  ;;  %v2349_v53 = vand.u32 4294901760, %v176_v50  ;;  %v2372_v63 = vand.u32 4294901760, %v179_v58  ;;  %v159_v44 = vld [vmem:[%s3011_s1 + $0x30] sm:$0xff] }
  0x21   : > { %311 = vmatpush.msra.mxu1 %v310_v31  ;;  %694 = vmatpush.msrb.mxu3 %v693_v36  ;;  %v225_v41 = vsub.f32 %v2306_v33, %v2316_v39  ;;  %3031 = vst [vmem:[#allocation6_spill] sm:$0xff] %v2322_v42  ;;  %v233_v48 = vsub.f32 %v2310_v34, %v2322_v42  ;;  %v703_v0 = vand.u32 4294901760, %v702_v60  ;;  %v996_v46 = vand.u32 4294901760, %v159_v44  ;;  %p2136_p12 = pnand %p2135_p11, %p2237_p5  ;;  %p2141_p2 = por %p2140_p1, %p2139_p0 }
  0x22   : > { %436 = vmatmul.f32.vlgmr.msra.gmra.mxu3 %v2316_v39  ;;  %608 = vmatpush.msrb.mxu2 %v2290_v22  ;;  %v241_v55 = vsub.f32 %v2336_v49, %v2347_v52  ;;  %v2359_v56 = vsub.f32 %v176_v50, %v2349_v53 }
  0x23   : > { %317 = vmatpush.msra.mxu1 %v316_v35  ;;  %506 = vmatpush.msrb.mxu0 %v314_v14  ;;  %v2327_v45 = vand.u32 4294901760, %v225_v41  ;;  %v2344_v51 = vand.u32 4294901760, %v233_v48  ;;  %v704_v2 = vsub.f32 %v702_v60, %v703_v0  ;;  %v185_v14 = vsel %vm165_vm1, %v151_v10, 0  ;;  %p2137_p13 = pneg %p2136_p12 }
  0x24   : > { %319 = vmatmul.f32.vlgmr.msra.gmra.mxu1 %v2296_v27  ;;  %700 = vmatpush.msrb.mxu3 %v699_v47  ;;  %v2367_v61 = vand.u32 4294901760, %v241_v55  ;;  %v2370_v62 = vand.u32 4294901760, %v2359_v56  ;;  %v2412_v16 = vand.u32 4294901760, %v185_v14  ;;  %v198_v35 = vsel %vm190_vm0, %v163_v32, 0 }
  0x25   : > { %554 = vmatpush.msrb.mxu1 %v2262_v6  ;;  %227 = vmatmul.f32.vlgmr.msra.gmra.mxu0 %v2327_v45  ;;  %v705_v6 = vand.u32 4294901760, %v704_v2  ;;  %v2480_v36 = vand.u32 4294901760, %v198_v35  ;;  %v1085_v47 = vsub.f32 %v159_v44, %v996_v46  ;;  %p2142_p3 = pnand %p2141_p2, %p2137_p13 }
  0x26   : > { %755 = vmatpush.msra.mxu0 %v2285_v17  ;;  %610 = vmatpush.msrb.mxu2 %v609_v59  ;;  %v249_v3 = vsub.f32 %v2359_v56, %v2370_v62  ;;  %3032 = vst [vmem:[#allocation7_spill] sm:$0xff] %v2412_v16  ;;  %v152_v17 = vld [vmem:[%s2282_s7 + $0x38] sm:$0xff]  ;;  %v2420_v19 = vsub.f32 %v185_v14, %v2412_v16 }
  0x27   : > { %556 = vmatpush.msrb.mxu1 %v2258_v4  ;;  %v2382_v4 = vsub.f32 %v179_v58, %v2372_v63  ;;  %706 = vmatpush.msrb.mxu3 %v705_v6  ;;  %v188_v20 = vsel %vm165_vm1, %v152_v17, 0  ;;  %v1079_v37 = vsub.f32 %v198_v35, %v2480_v36  ;;  %v1086_v48 = vand.u32 4294901760, %v1085_v47 }
  0x28   : > { %380 = vmatmul.f32.gmra.mxu2 %v2310_v34  ;;  %758 = vmatpush.msra.mxu0 %v696_v38  ;;  %v2387_v7 = vand.u32 4294901760, %v249_v3  ;;  %v2430_v23 = vand.u32 4294901760, %v188_v20  ;;  %v155_v3 = vld [vmem:[%s3011_s1 + $0x10] sm:$0xff] }
  0x29   : > { %558 = vmatpush.msrb.mxu1 %v2260_v5  ;;  %887 = vmatpush.msra.mxu2 %v691_v25  ;;  %v182_v5 = vsel %vm165_vm1, %v150_v1, 0  ;;  %v2390_v8 = vand.u32 4294901760, %v2382_v4  ;;  %v1080_v38 = vand.u32 4294901760, %v1079_v37  ;;  %v1087_v50 = vsub.f32 %v1085_v47, %v1086_v48 }
  0x2a   : > { %442 = vmatmul.f32.gmra.mxu3 %v2322_v42  ;;  %761 = vmatpush.msra.mxu0 %v702_v60  ;;  %v2392_v9 = vand.u32 4294901760, %v182_v5  ;;  %3034 = vst [vmem:[#allocation9_spill] sm:$0xff] %v2430_v23  ;;  %v2437_v25 = vsub.f32 %v188_v20, %v2430_v23  ;;  %v998_v6 = vand.u32 4294901760, %v155_v3 }
  0x2b   : > { %817 = vmatpush.msra.mxu1 %v2273_v12  ;;  %891 = vmatpush.msra.mxu2 %v697_v40  ;;  %v257_v11 = vsub.f32 %v2382_v4, %v2390_v8  ;;  %v1081_v40 = vsub.f32 %v1079_v37, %v1080_v38  ;;  %v1088_v55 = vand.u32 4294901760, %v1087_v50 }
  0x2c   : > { %323 = vmatmul.f32.gmra.mxu1 %v2299_v28  ;;  %943 = vmatpush.msra.mxu3 %v2273_v12  ;;  %v2402_v13 = vsub.f32 %v182_v5, %v2392_v9  ;;  %v2444_v29 = vand.u32 4294901760, %v2437_v25  ;;  %v1091_v14 = vsub.f32 %v155_v3, %v998_v6 }
  0x2d   : > { %819 = vmatpush.msra.mxu1 %v2290_v22  ;;  %235 = vmatmul.f32.gmra.mxu0 %v2344_v51  ;;  %v2407_v12 = vand.u32 4294901760, %v257_v11  ;;  %v1082_v41 = vand.u32 4294901760, %v1081_v40 }
  0x2e   : > { %895 = vmatpush.msra.mxu2 %v703_v0  ;;  %945 = vmatpush.msra.mxu3 %v2290_v22  ;;  %v2410_v15 = vand.u32 4294901760, %v2402_v13  ;;  %v2428_v22 = vand.u32 4294901760, %v2420_v19  ;;  %3036 = vst [vmem:[#allocation11_spill] sm:$0xff] %v2444_v29  ;;  %v281_v30 = vsub.f32 %v2437_v25, %v2444_v29 }
  0x2f   : > { %821 = vmatpush.msra.mxu1 %v609_v59 }
  0x30   : > { %385 = vmatmul.f32.gmra.mxu2 %v2336_v49  ;;  %947 = vmatpush.msra.mxu3 %v609_v59  ;;  %v265_v18 = vsub.f32 %v2402_v13, %v2410_v15  ;;  %3033 = vst [vmem:[#allocation8_spill] sm:$0xff] %v2428_v22  ;;  %v273_v24 = vsub.f32 %v2420_v19, %v2428_v22  ;;  %v2452_v31 = vand.u32 4294901760, %v281_v30 }
  0x32   : > { %448 = vmatmul.f32.gmra.mxu3 %v2347_v52  ;;  %v2425_v21 = vand.u32 4294901760, %v265_v18  ;;  %v2441_v26 = vand.u32 4294901760, %v273_v24  ;;  %3037 = vst [vmem:[#allocation12_spill] sm:$0xff] %v2452_v31  ;;  %v1092_v18 = vand.u32 4294901760, %v1091_v14 }
  0x34   : > { %327 = vmatmul.f32.gmra.mxu1 %v2324_v43  ;;  %3035 = vst [vmem:[#allocation10_spill] sm:$0xff] %v2441_v26  ;;  %v1093_v20 = vsub.f32 %v1091_v14, %v1092_v18 }
  0x35   : > { %243 = vmatmul.f32.gmra.mxu0 %v2367_v61 }
  0x36   : > { %v1094_v30 = vand.u32 4294901760, %v1093_v20 }
  0x38   : > { %390 = vmatmul.f32.gmra.mxu2 %v2359_v56 }
  0x3a   : > { %454 = vmatmul.f32.gmra.mxu3 %v2370_v62 }
  0x3c   : > { %331 = vmatmul.f32.gmra.mxu1 %v2349_v53 }
  0x3d   : > { %251 = vmatmul.f32.gmra.mxu0 %v2387_v7 }
  0x40   : > { %395 = vmatmul.f32.gmra.mxu2 %v2382_v4 }
  0x42   : > { %460 = vmatmul.f32.gmra.mxu3 %v2390_v8 }
  0x44   : > { %335 = vmatmul.f32.gmra.mxu1 %v2372_v63 }
  0x45   : > { %259 = vmatmul.f32.gmra.mxu0 %v2407_v12 }
  0x48   : > { %400 = vmatmul.f32.gmra.mxu2 %v2402_v13 }
  0x4a   : > { %466 = vmatmul.f32.gmra.mxu3 %v2410_v15 }
  0x4c   : > { %339 = vmatmul.f32.gmra.mxu1 %v2392_v9 }
  0x4d   : > { %267 = vmatmul.f32.gmra.mxu0 %v2425_v21 }
  0x50   : > { %405 = vmatmul.f32.gmra.mxu2 %v2420_v19 }
  0x52   : > { %472 = vmatmul.f32.gmra.mxu3 %v2428_v22 }
  0x54   : > { %343 = vmatmul.f32.gmra.mxu1 %v2412_v16 }
  0x55   : > { %275 = vmatmul.f32.gmra.mxu0 %v2441_v26 }
  0x58   : > { %410 = vmatmul.f32.gmra.mxu2 %v2437_v25 }
  0x5a   : > { %478 = vmatmul.f32.gmra.mxu3 %v2444_v29 }
  0x5c   : > { %347 = vmatmul.f32.gmra.mxu1 %v2430_v23 }
  0x5d   : > { %283 = vmatmul.f32.gmra.mxu0 %v2452_v31 }
  0x60   : > { %616 = vmatmul.f32.vlgmr.msrb.gmra.mxu2 %v2327_v45 }
  0x61   : > { %1144 = vmatpush.msrb.mxu2 %v1079_v37 }
  0x62   : > { %708 = vmatmul.f32.vlgmr.msrb.gmra.mxu3 %v2296_v27 }
  0x63   : > { %1206 = vmatpush.msrb.mxu3 %v2480_v36  ;;  %1147 = vmatpush.msrb.mxu2 %v1085_v47 }
  0x64   : > { %560 = vmatmul.f32.vlgmr.msrb.gmra.mxu1 %v2296_v27 }
  0x65   : > { %508 = vmatmul.f32.vlgmr.msrb.gmra.mxu0 %v2296_v27  ;;  %1083 = vmatpush.msrb.mxu1 %v1082_v41 }
  0x66   : > { %995 = vmatpush.msrb.mxu0 %v2480_v36  ;;  %1208 = vmatpush.msrb.mxu3 %v996_v46 }
  0x67   : > { %1089 = vmatpush.msrb.mxu1 %v1088_v55  ;;  %1150 = vmatpush.msrb.mxu2 %v1091_v14  ;;  %v164_v14 = vld [vmem:[%s3011_s1 + $0x58] sm:$0x1] }
  0x68   : > { %624 = vmatmul.f32.gmra.mxu2 %v2344_v51  ;;  %997 = vmatpush.msrb.mxu0 %v996_v46 }
  0x69   : > { %1210 = vmatpush.msrb.mxu3 %v998_v6  ;;  %1095 = vmatpush.msrb.mxu1 %v1094_v30 }
  0x6a   : > { %712 = vmatmul.f32.gmra.mxu3 %v2299_v28  ;;  %999 = vmatpush.msrb.mxu0 %v998_v6 }
  0x6c   : > { %564 = vmatmul.f32.gmra.mxu1 %v2299_v28 }
  0x6d   : > { %512 = vmatmul.f32.gmra.mxu0 %v2299_v28 }
  0x70   : > { %632 = vmatmul.f32.gmra.mxu2 %v2367_v61 }
  0x72   : > { %716 = vmatmul.f32.gmra.mxu3 %v2324_v43 }
  0x74   : > { %568 = vmatmul.f32.gmra.mxu1 %v2324_v43 }
  0x75   : > { %516 = vmatmul.f32.gmra.mxu0 %v2324_v43 }
  0x78   : > { %640 = vmatmul.f32.gmra.mxu2 %v2387_v7 }
  0x7a   : > { %720 = vmatmul.f32.gmra.mxu3 %v2349_v53 }
  0x7c   : > { %572 = vmatmul.f32.gmra.mxu1 %v2349_v53 }
  0x7d   : > { %520 = vmatmul.f32.gmra.mxu0 %v2349_v53 }
  0x80   : > { %648 = vmatmul.f32.gmra.mxu2 %v2407_v12 }
  0x82   : > { %724 = vmatmul.f32.gmra.mxu3 %v2372_v63 }
  0x84   : > { %576 = vmatmul.f32.gmra.mxu1 %v2372_v63 }
  0x85   : > { %524 = vmatmul.f32.gmra.mxu0 %v2372_v63 }
  0x88   : > { %656 = vmatmul.f32.gmra.mxu2 %v2425_v21 }
  0x8a   : > { %728 = vmatmul.f32.gmra.mxu3 %v2392_v9 }
  0x8c   : > { %580 = vmatmul.f32.gmra.mxu1 %v2392_v9 }
  0x8d   : > { %528 = vmatmul.f32.gmra.mxu0 %v2392_v9 }
  0x90   : > { %664 = vmatmul.f32.gmra.mxu2 %v2441_v26 }
  0x92   : > { %732 = vmatmul.f32.gmra.mxu3 %v2412_v16 }
  0x94   : > { %584 = vmatmul.f32.gmra.mxu1 %v2412_v16 }
  0x95   : > { %532 = vmatmul.f32.gmra.mxu0 %v2412_v16 }
  0x98   : > { %672 = vmatmul.f32.gmra.mxu2 %v2452_v31 }
  0x9a   : > { %736 = vmatmul.f32.gmra.mxu3 %v2430_v23 }
  0x9c   : > { %588 = vmatmul.f32.gmra.mxu1 %v2430_v23 }
  0x9d   : > { %536 = vmatmul.f32.gmra.mxu0 %v2430_v23 }
  0xa0   : > { %897 = vmatmul.f32.vlgmr.msra.gmra.mxu2 %v2296_v27 }
  0xa1   : > { %v2501_v54 = vpop.f32.mrf.mxu1 }
  0xa2   : > { %949 = vmatmul.f32.vlgmr.msra.gmra.mxu3 %v2296_v27  ;;  %v2504_v57 = vpop.f32.mrf.mxu0 }
  0xa3   : > { %v2506_v58 = vpop.f32.mrf.mxu2  ;;  %v321_v26 = vadd.f32 %v2501_v54, %v2504_v57 }
  0xa4   : > { %825 = vmatmul.f32.vlgmr.msra.gmra.mxu1 %v2316_v39 }
  0xa5   : > { %v2509_v59 = vpop.f32.mrf.mxu3  ;;  %764 = vmatmul.f32.vlgmr.msra.gmra.mxu0 %v2306_v33  ;;  %1332 = vmatpush.msra.mxu1 %v2480_v36 }
  0xa6   : > { %1276 = vmatpush.msra.mxu0 %v1080_v38 }
  0xa7   : > { %1334 = vmatpush.msra.mxu1 %v996_v46 }
  0xa8   : > { %901 = vmatmul.f32.gmra.mxu2 %v2299_v28  ;;  %1280 = vmatpush.msra.mxu0 %v1086_v48 }
  0xa9   : > { %v2513_v60 = vpop.f32.mrf.mxu1  ;;  %1336 = vmatpush.msra.mxu1 %v998_v6 }
  0xaa   : > { %953 = vmatmul.f32.gmra.mxu3 %v2299_v28  ;;  %v2516_v0 = vpop.f32.mrf.mxu0  ;;  %1284 = vmatpush.msra.mxu0 %v1092_v18  ;;  %v201_v18 = vsel %vm190_vm0, %v164_v14, 0 }
  0xab   : > { %v2518_v1 = vpop.f32.mrf.mxu2  ;;  %v2592_v20 = vand.u32 4294901760, %v201_v18 }
  0xac   : > { %831 = vmatmul.f32.gmra.mxu1 %v2322_v42 }
  0xad   : > { %v2521_v2 = vpop.f32.mrf.mxu3  ;;  %769 = vmatmul.f32.gmra.mxu0 %v2310_v34  ;;  %1384 = vmatpush.msra.mxu2 %v2592_v20  ;;  %v2599_v31 = vsub.f32 %v201_v18, %v2592_v20 }
  0xaf   : > { %v3025_v14 = vand.u32 4294901760, %v2599_v31 }
  0xb0   : > { %905 = vmatmul.f32.gmra.mxu2 %v2324_v43 }
  0xb1   : > { %v2528_v5 = vpop.f32.mrf.mxu1  ;;  %v1470_v18 = vsub.f32 %v2599_v31, %v3025_v14 }
  0xb2   : > { %957 = vmatmul.f32.gmra.mxu3 %v2324_v43  ;;  %v2531_v10 = vpop.f32.mrf.mxu0 }
  0xb3   : > { %v2533_v11 = vpop.f32.mrf.mxu2  ;;  %v1471_v54 = vand.u32 4294901760, %v1470_v18 }
  0xb4   : > { %837 = vmatmul.f32.gmra.mxu1 %v2347_v52 }
  0xb5   : > { %v2536_v17 = vpop.f32.mrf.mxu3  ;;  %774 = vmatmul.f32.gmra.mxu0 %v2336_v49  ;;  %1472 = vmatpush.msra.mxu3 %v1471_v54 }
  0xb8   : > { %909 = vmatmul.f32.gmra.mxu2 %v2349_v53 }
  0xb9   : > { %v2540_v24 = vpop.f32.mrf.mxu1 }
  0xba   : > { %961 = vmatmul.f32.gmra.mxu3 %v2349_v53  ;;  %v2543_v32 = vpop.f32.mrf.mxu0 }
  0xbb   : > { %v2545_v35 = vpop.f32.mrf.mxu2 }
  0xbc   : > { %843 = vmatmul.f32.gmra.mxu1 %v2370_v62 }
  0xbd   : > { %v2548_v37 = vpop.f32.mrf.mxu3  ;;  %779 = vmatmul.f32.gmra.mxu0 %v2359_v56 }
  0xc0   : > { %913 = vmatmul.f32.gmra.mxu2 %v2372_v63 }
  0xc1   : > { %v2553_v38 = vpop.f32.mrf.mxu1 }
  0xc2   : > { %965 = vmatmul.f32.gmra.mxu3 %v2372_v63  ;;  %v2556_v40 = vpop.f32.mrf.mxu0 }
  0xc3   : > { %v2558_v41 = vpop.f32.mrf.mxu2 }
  0xc4   : > { %849 = vmatmul.f32.gmra.mxu1 %v2390_v8 }
  0xc5   : > { %v2561_v44 = vpop.f32.mrf.mxu3  ;;  %784 = vmatmul.f32.gmra.mxu0 %v2382_v4 }
  0xc8   : > { %917 = vmatmul.f32.gmra.mxu2 %v2392_v9 }
  0xc9   : > { %v2565_v36 = vpop.f32.mrf.mxu1 }
  0xca   : > { %969 = vmatmul.f32.gmra.mxu3 %v2392_v9  ;;  %v2568_v46 = vpop.f32.mrf.mxu0 }
  0xcb   : > { %v2570_v47 = vpop.f32.mrf.mxu2 }
  0xcc   : > { %855 = vmatmul.f32.gmra.mxu1 %v2410_v15 }
  0xcd   : > { %v2573_v48 = vpop.f32.mrf.mxu3  ;;  %789 = vmatmul.f32.gmra.mxu0 %v2402_v13 }
  0xd0   : > { %921 = vmatmul.f32.gmra.mxu2 %v2412_v16 }
  0xd1   : > { %v2577_v50 = vpop.f32.mrf.mxu1 }
  0xd2   : > { %973 = vmatmul.f32.gmra.mxu3 %v2412_v16  ;;  %v2580_v55 = vpop.f32.mrf.mxu0 }
  0xd3   : > { %v2582_v3 = vpop.f32.mrf.mxu2 }
  0xd4   : > { %861 = vmatmul.f32.gmra.mxu1 %v2428_v22 }
  0xd5   : > { %v2585_v6 = vpop.f32.mrf.mxu3  ;;  %794 = vmatmul.f32.gmra.mxu0 %v2420_v19 }
  0xd6   : > { %3038 = vst [vmem:[#allocation13_spill] sm:$0xff] %v2585_v6 }
  0xd8   : > { %925 = vmatmul.f32.gmra.mxu2 %v2430_v23 }
  0xd9   : > { %v2595_v30 = vpop.f32.mrf.mxu1 }
  0xda   : > { %3039 = vst [vmem:[#allocation14_spill] sm:$0xff] %v2595_v30  ;;  %977 = vmatmul.f32.gmra.mxu3 %v2430_v23  ;;  %v2604_v16 = vpop.f32.mrf.mxu0  ;;  %v377_v30 = vadd.f32 %v2506_v58, %v321_v26  ;;  %v160_v58 = vld [vmem:[%s3011_s1 + $0x38] sm:$0xff] }
  0xdb   : > { %v2606_v22 = vpop.f32.mrf.mxu2 }
  0xdc   : > { %3040 = vst [vmem:[#allocation15_spill] sm:$0xff] %v2606_v22  ;;  %867 = vmatmul.f32.gmra.mxu1 %v2444_v29  ;;  %v438_v23 = vadd.f32 %v2509_v59, %v377_v30  ;;  %v325_v29 = vadd.f32 %v2513_v60, %v2516_v0  ;;  %v2633_v0 = vand.u32 4294901760, %v160_v58 }
  0xdd   : > { %v2610_v6 = vpop.f32.mrf.mxu3  ;;  %799 = vmatmul.f32.gmra.mxu0 %v2437_v25 }
  0xde   : > { %3041 = vst [vmem:[#allocation16_spill] sm:$0xff] %v2610_v6  ;;  %v382_v59 = vadd.f32 %v2518_v1, %v325_v29  ;;  %1386 = vmatpush.msra.mxu2 %v2633_v0  ;;  %v329_v29 = vadd.f32 %v2528_v5, %v2531_v10 }
  0xe0   : > { %1153 = vmatmul.f32.vlgmr.msrb.gmra.mxu2 %v2306_v33  ;;  %v444_v30 = vadd.f32 %v2521_v2, %v382_v59  ;;  %v387_v2 = vadd.f32 %v2533_v11, %v329_v29 }
  0xe1   : > { %v561_v57 = vpop.f32.mrf.mxu1 }
  0xe2   : > { %1214 = vmatmul.f32.vlgmr.msrb.gmra.mxu3 %v2316_v39  ;;  %v509_v6 = vpop.f32.mrf.mxu0 }
  0xe3   : > { %v2622_v22 = vpop.f32.mrf.mxu2  ;;  %v510_v14 = vadd.f32 %v509_v6, %v438_v23 }
  0xe4   : > { %1097 = vmatmul.f32.vlgmr.msrb.gmra.mxu1 %v2296_v27 }
  0xe5   : > { %v2625_v26 = vpop.f32.mrf.mxu3  ;;  %1595 = vmatpush.msrb.mxu1 %v2592_v20  ;;  %v562_v60 = vadd.f32 %v561_v57, %v510_v14  ;;  %1005 = vmatmul.f32.vlgmr.msrb.gmra.mxu0 %v2327_v45 }
  0xe6   : > { %1533 = vmatpush.msrb.mxu0 %v2599_v31 }
  0xe7   : > { %v1759_v23 = vmul.f32 %v562_v60, %v562_v60  ;;  %1597 = vmatpush.msrb.mxu1 %v2633_v0 }
  0xe8   : > { %1158 = vmatmul.f32.gmra.mxu2 %v2310_v34  ;;  %v1474_v34 = vsub.f32 %v160_v58, %v2633_v0  ;;  %v333_v58 = vadd.f32 %v2540_v24, %v2543_v32 }
  0xe9   : > { %v565_v6 = vpop.f32.mrf.mxu1  ;;  %v1791_v1 = vsub.f32 0.0, %v1759_v23 }
  0xea   : > { %1220 = vmatmul.f32.gmra.mxu3 %v2322_v42  ;;  %v513_v14 = vpop.f32.mrf.mxu0  ;;  %v1475_v5 = vand.u32 4294901760, %v1474_v34  ;;  %1536 = vmatpush.msrb.mxu0 %v1474_v34 }
  0xeb   : > { %v2643_v18 = vpop.f32.mrf.mxu2  ;;  %v1823_v54 = vmul.f32 1.442695, %v1791_v1  ;;  %v514_v57 = vadd.f32 %v513_v14, %v444_v30  ;;  %v450_v1 = vadd.f32 %v2536_v17, %v387_v2  ;;  %v392_v17 = vadd.f32 %v2545_v35, %v333_v58  ;;  %v156_v2 = vld [vmem:[%s3011_s1 + $0x18] sm:$0xff] }
  0xec   : > { %1101 = vmatmul.f32.gmra.mxu1 %v2299_v28  ;;  %v1476_v30 = vsub.f32 %v1474_v34, %v1475_v5 }
  0xed   : > { %v2647_v60 = vpop.f32.mrf.mxu3  ;;  %2054 = vpow2.f32 %v1823_v54  ;;  %v566_v59 = vadd.f32 %v565_v6, %v514_v57  ;;  %1013 = vmatmul.f32.gmra.mxu0 %v2344_v51 }
  0xee   : > { %v1477_v29 = vand.u32 4294901760, %v1476_v30  ;;  %v456_v30 = vadd.f32 %v2548_v37, %v392_v17 }
  0xef   : > { %v1763_v10 = vmul.f32 %v566_v59, %v566_v59 }
  0xf0   : > { %1163 = vmatmul.f32.gmra.mxu2 %v2336_v49  ;;  %1478 = vmatpush.msra.mxu3 %v1477_v29 }
  0xf1   : > { %v569_v23 = vpop.f32.mrf.mxu1  ;;  %v1795_v14 = vsub.f32 0.0, %v1763_v10  ;;  %v1387_v10 = vand.u32 4294901760, %v156_v2 }
  0xf2   : > { %1226 = vmatmul.f32.gmra.mxu3 %v2347_v52  ;;  %v517_v11 = vpop.f32.mrf.mxu0 }
  0xf3   : > { %v2659_v6 = vpop.f32.mrf.mxu2  ;;  %v2055_v54 = vpop.eup %2054  ;;  %v1831_v57 = vmul.f32 1.442695, %v1795_v14  ;;  %v518_v42 = vadd.f32 %v517_v11, %v450_v1  ;;  %v337_v1 = vadd.f32 %v2553_v38, %v2556_v40  ;;  %1388 = vmatpush.msra.mxu2 %v1387_v10  ;;  %v1480_v58 = vsub.f32 %v156_v2, %v1387_v10  ;;  %1599 = vmatpush.msrb.mxu1 %v1387_v10 }
  0xf4   : > { %1105 = vmatmul.f32.gmra.mxu1 %v2324_v43  ;;  %1887 = vst [vmem:[%s2662_s3] sm:$0xff] %v2055_v54  ;;  %v3042_v54 = vand.u32 4294901760, %v2599_v31 }
  0xf5   : > { %v2665_v34 = vpop.f32.mrf.mxu3  ;;  %2056 = vpow2.f32 %v1831_v57  ;;  %v570_v24 = vadd.f32 %v569_v23, %v518_v42  ;;  %1021 = vmatmul.f32.gmra.mxu0 %v2367_v61  ;;  %v1481_v38 = vand.u32 4294901760, %v1480_v58  ;;  %v397_v40 = vadd.f32 %v2558_v41, %v337_v1 }
  0xf6   : > { %1665 = vmatpush.msrb.mxu2 %v3042_v54  ;;  %1539 = vmatpush.msrb.mxu0 %v1480_v58 }
  0xf7   : > { %v1767_v32 = vmul.f32 %v570_v24, %v570_v24  ;;  %v1482_v17 = vsub.f32 %v1480_v58, %v1481_v38  ;;  %v462_v2 = vadd.f32 %v2561_v44, %v397_v40 }
  0xf8   : > { %1168 = vmatmul.f32.gmra.mxu2 %v2359_v56 }
  0xf9   : > { %v573_v59 = vpop.f32.mrf.mxu1  ;;  %v1799_v35 = vsub.f32 0.0, %v1767_v32  ;;  %1669 = vmatpush.msrb.mxu2 %v1475_v5  ;;  %v1483_v31 = vand.u32 4294901760, %v1482_v17  ;;  %v3043_v17 = vld [vmem:[#allocation13_spill] sm:$0xff] }
  0xfa   : > { %1232 = vmatmul.f32.gmra.mxu3 %v2370_v62  ;;  %v521_v42 = vpop.f32.mrf.mxu0 }
  0xfb   : > { %v2677_v23 = vpop.f32.mrf.mxu2  ;;  %v2057_v14 = vpop.eup %2056  ;;  %v1839_v11 = vmul.f32 1.442695, %v1799_v35  ;;  %v522_v29 = vadd.f32 %v521_v42, %v456_v30  ;;  %1673 = vmatpush.msrb.mxu2 %v1481_v38  ;;  %v341_v30 = vadd.f32 %v2565_v36, %v2568_v46  ;;  %1484 = vmatpush.msra.mxu3 %v1483_v31 }
  0xfc   : > { %1109 = vmatmul.f32.gmra.mxu1 %v2349_v53  ;;  %1891 = vst [vmem:[%s2662_s3 + $0x20] sm:$0xff] %v2057_v14 }
  0xfd   : > { %v2683_v37 = vpop.f32.mrf.mxu3  ;;  %2058 = vpow2.f32 %v1839_v11  ;;  %v574_v57 = vadd.f32 %v573_v59, %v522_v29  ;;  %1029 = vmatmul.f32.gmra.mxu0 %v2387_v7  ;;  %1721 = vmatpush.msrb.mxu3 %v2592_v20  ;;  %v402_v44 = vadd.f32 %v2570_v47, %v341_v30  ;;  %v345_v20 = vadd.f32 %v2577_v50, %v2580_v55  ;;  %v3045_v30 = vld [vmem:[#allocation8_spill] sm:$0xff] }
  0xff   : > { %v1771_v24 = vmul.f32 %v574_v57, %v574_v57  ;;  %1723 = vmatpush.msrb.mxu3 %v2633_v0  ;;  %v468_v11 = vadd.f32 %v2573_v48, %v402_v44 }
 0x100   : > { %1173 = vmatmul.f32.gmra.mxu2 %v2382_v4 }
 0x101   : > { %v577_v32 = vpop.f32.mrf.mxu1  ;;  %v1803_v35 = vsub.f32 0.0, %v1771_v24  ;;  %1725 = vmatpush.msrb.mxu3 %v1387_v10  ;;  %v407_v10 = vadd.f32 %v2582_v3, %v345_v20 }
 0x102   : > { %1238 = vmatmul.f32.gmra.mxu3 %v2390_v8  ;;  %v525_v41 = vpop.f32.mrf.mxu0 }
 0x103   : > { %v2692_v59 = vpop.f32.mrf.mxu2  ;;  %v2059_v5 = vpop.eup %2058  ;;  %v1847_v1 = vmul.f32 1.442695, %v1803_v35  ;;  %v526_v42 = vadd.f32 %v525_v41, %v462_v2  ;;  %v474_v24 = vadd.f32 %v3043_v17, %v407_v10 }
 0x104   : > { %1113 = vmatmul.f32.gmra.mxu1 %v2372_v63  ;;  %1895 = vst [vmem:[%s2662_s3 + $0x40] sm:$0xff] %v2059_v5 }
 0x105   : > { %v2697_v58 = vpop.f32.mrf.mxu3  ;;  %2060 = vpow2.f32 %v1847_v1  ;;  %v578_v36 = vadd.f32 %v577_v32, %v526_v42  ;;  %1037 = vmatmul.f32.gmra.mxu0 %v2407_v12  ;;  %v3044_v32 = vld [vmem:[#allocation14_spill] sm:$0xff]  ;;  %v3046_v42 = vld [vmem:[#allocation7_spill] sm:$0xff] }
 0x106   : > { %v349_v31 = vadd.f32 %v3044_v32, %v2604_v16  ;;  %v3048_v16 = vld [vmem:[#allocation10_spill] sm:$0xff] }
 0x107   : > { %v1775_v46 = vmul.f32 %v578_v36, %v578_v36  ;;  %v3047_v36 = vld [vmem:[#allocation15_spill] sm:$0xff] }
 0x108   : > { %1178 = vmatmul.f32.gmra.mxu2 %v2402_v13 }
 0x109   : > { %v581_v14 = vpop.f32.mrf.mxu1  ;;  %v1807_v29 = vsub.f32 0.0, %v1775_v46  ;;  %v412_v46 = vadd.f32 %v3047_v36, %v349_v31  ;;  %v3052_v31 = vld [vmem:[#allocation12_spill] sm:$0xff] }
 0x10a   : > { %1244 = vmatmul.f32.gmra.mxu3 %v2410_v15  ;;  %v529_v47 = vpop.f32.mrf.mxu0 }
 0x10b   : > { %v2707_v54 = vpop.f32.mrf.mxu2  ;;  %v2061_v38 = vpop.eup %2060  ;;  %v1855_v40 = vmul.f32 1.442695, %v1807_v29  ;;  %v530_v57 = vadd.f32 %v529_v47, %v468_v11  ;;  %v3049_v29 = vld [vmem:[#allocation16_spill] sm:$0xff] }
 0x10c   : > { %1117 = vmatmul.f32.gmra.mxu1 %v2392_v9  ;;  %1899 = vst [vmem:[%s2662_s3 + $0x60] sm:$0xff] %v2061_v38  ;;  %v480_v47 = vadd.f32 %v3049_v29, %v412_v46 }
 0x10d   : > { %v2711_v0 = vpop.f32.mrf.mxu3  ;;  %2062 = vpow2.f32 %v1855_v40  ;;  %v582_v48 = vadd.f32 %v581_v14, %v530_v57  ;;  %1045 = vmatmul.f32.gmra.mxu0 %v2425_v21  ;;  %v3050_v40 = vld [vmem:[#allocation11_spill] sm:$0xff] }
 0x10f   : > { %v1779_v50 = vmul.f32 %v582_v48, %v582_v48 }
 0x110   : > { %1183 = vmatmul.f32.gmra.mxu2 %v2420_v19 }
 0x111   : > { %v585_v55 = vpop.f32.mrf.mxu1  ;;  %v1811_v2 = vsub.f32 0.0, %v1779_v50 }
 0x112   : > { %1250 = vmatmul.f32.gmra.mxu3 %v3045_v30  ;;  %v533_v35 = vpop.f32.mrf.mxu0 }
 0x113   : > { %v2720_v41 = vpop.f32.mrf.mxu2  ;;  %v2063_v3 = vpop.eup %2062  ;;  %v1863_v5 = vmul.f32 1.442695, %v1811_v2  ;;  %v534_v1 = vadd.f32 %v533_v35, %v474_v24  ;;  %v3051_v24 = vld [vmem:[#allocation9_spill] sm:$0xff] }
 0x114   : > { %1121 = vmatmul.f32.gmra.mxu1 %v3046_v42  ;;  %1903 = vst [vmem:[%s2662_s3 + $0x80] sm:$0xff] %v2063_v3  ;;  %v710_v3 = vadd.f32 %v2625_v26, %v2622_v22  ;;  %v714_v26 = vadd.f32 %v2647_v60, %v2643_v18  ;;  %v718_v60 = vadd.f32 %v2665_v34, %v2659_v6 }
 0x115   : > { %v2724_v44 = vpop.f32.mrf.mxu3  ;;  %2064 = vpow2.f32 %v1863_v5  ;;  %v586_v14 = vadd.f32 %v585_v55, %v534_v1  ;;  %1053 = vmatmul.f32.gmra.mxu0 %v3048_v16  ;;  %v722_v34 = vadd.f32 %v2683_v37, %v2677_v23  ;;  %v726_v37 = vadd.f32 %v2697_v58, %v2692_v59 }
 0x116   : > { %v730_v58 = vadd.f32 %v2711_v0, %v2707_v54  ;;  %v734_v0 = vadd.f32 %v2724_v44, %v2720_v41 }
 0x117   : > { %v1783_v11 = vmul.f32 %v586_v14, %v586_v14 }
 0x118   : > { %1188 = vmatmul.f32.gmra.mxu2 %v2437_v25 }
 0x119   : > { %v589_v20 = vpop.f32.mrf.mxu1  ;;  %v1815_v38 = vsub.f32 0.0, %v1783_v11 }
 0x11a   : > { %1256 = vmatmul.f32.gmra.mxu3 %v3050_v40  ;;  %v537_v57 = vpop.f32.mrf.mxu0 }
 0x11b   : > { %v2731_v10 = vpop.f32.mrf.mxu2  ;;  %v2065_v48 = vpop.eup %2064  ;;  %v1871_v50 = vmul.f32 1.442695, %v1815_v38  ;;  %v538_v17 = vadd.f32 %v537_v57, %v480_v47 }
 0x11c   : > { %1125 = vmatmul.f32.gmra.mxu1 %v3051_v24  ;;  %1907 = vst [vmem:[%s2662_s3 + $0xa0] sm:$0xff] %v2065_v48 }
 0x11d   : > { %v2735_v55 = vpop.f32.mrf.mxu3  ;;  %2066 = vpow2.f32 %v1871_v50  ;;  %v590_v32 = vadd.f32 %v589_v20, %v538_v17  ;;  %1061 = vmatmul.f32.gmra.mxu0 %v3052_v31 }
 0x11e   : > { %v738_v44 = vadd.f32 %v2735_v55, %v2731_v10 }
 0x11f   : > { %v1787_v2 = vmul.f32 %v590_v32, %v590_v32 }
 0x120   : > { %1394 = vmatmul.f32.vlgmr.msra.gmra.mxu2 %v2327_v45 }
 0x121   : > { %v826_v35 = vpop.f32.mrf.mxu1  ;;  %v1819_v5 = vsub.f32 0.0, %v1787_v2 }
 0x122   : > { %1486 = vmatmul.f32.vlgmr.msra.gmra.mxu3 %v2296_v27  ;;  %v765_v1 = vpop.f32.mrf.mxu0 }
 0x123   : > { %v898_v36 = vpop.f32.mrf.mxu2  ;;  %v2067_v46 = vpop.eup %2066  ;;  %v1879_v14 = vmul.f32 1.442695, %v1819_v5  ;;  %v766_v11 = vadd.f32 %v765_v1, %v710_v3 }
 0x124   : > { %1338 = vmatmul.f32.vlgmr.msra.gmra.mxu1 %v2296_v27  ;;  %1911 = vst [vmem:[%s2662_s3 + $0xc0] sm:$0xff] %v2067_v46 }
 0x125   : > { %v950_v20 = vpop.f32.mrf.mxu3  ;;  %2068 = vpow2.f32 %v1879_v14  ;;  %v827_v29 = vadd.f32 %v826_v35, %v766_v11  ;;  %1286 = vmatmul.f32.vlgmr.msra.gmra.mxu0 %v2296_v27 }
 0x127   : > { %v899_v45 = vadd.f32 %v898_v36, %v827_v29 }
 0x128   : > { %1402 = vmatmul.f32.gmra.mxu2 %v2344_v51 }
 0x129   : > { %v832_v22 = vpop.f32.mrf.mxu1  ;;  %v951_v47 = vadd.f32 %v950_v20, %v899_v45 }
 0x12a   : > { %1490 = vmatmul.f32.gmra.mxu3 %v2299_v28  ;;  %v770_v38 = vpop.f32.mrf.mxu0 }
 0x12b   : > { %v902_v57 = vpop.f32.mrf.mxu2  ;;  %v2069_v48 = vpop.eup %2068  ;;  %v1760_v50 = vmul.f32 %v951_v47, %v951_v47  ;;  %v771_v17 = vadd.f32 %v770_v38, %v714_v26 }
 0x12c   : > { %1342 = vmatmul.f32.gmra.mxu1 %v2299_v28  ;;  %1915 = vst [vmem:[%s2662_s3 + $0xe0] sm:$0xff] %v2069_v48 }
 0x12d   : > { %v954_v32 = vpop.f32.mrf.mxu3  ;;  %v1792_v2 = vsub.f32 0.0, %v1760_v50  ;;  %v833_v35 = vadd.f32 %v832_v22, %v771_v17  ;;  %1290 = vmatmul.f32.gmra.mxu0 %v2299_v28 }
 0x12f   : > { %v1825_v51 = vmul.f32 1.442695, %v1792_v2  ;;  %v903_v3 = vadd.f32 %v902_v57, %v833_v35 }
 0x130   : > { %1410 = vmatmul.f32.gmra.mxu2 %v2367_v61 }
 0x131   : > { %v838_v18 = vpop.f32.mrf.mxu1  ;;  %2070 = vpow2.f32 %v1825_v51  ;;  %v955_v5 = vadd.f32 %v954_v32, %v903_v3 }
 0x132   : > { %1494 = vmatmul.f32.gmra.mxu3 %v2324_v43  ;;  %v775_v1 = vpop.f32.mrf.mxu0 }
 0x133   : > { %v906_v36 = vpop.f32.mrf.mxu2  ;;  %v1764_v46 = vmul.f32 %v955_v5, %v955_v5  ;;  %v776_v14 = vadd.f32 %v775_v1, %v718_v60 }
 0x134   : > { %1346 = vmatmul.f32.gmra.mxu1 %v2324_v43 }
 0x135   : > { %v958_v11 = vpop.f32.mrf.mxu3  ;;  %v1796_v20 = vsub.f32 0.0, %v1764_v46  ;;  %v839_v29 = vadd.f32 %v838_v18, %v776_v14  ;;  %1294 = vmatmul.f32.gmra.mxu0 %v2324_v43 }
 0x137   : > { %v2071_v61 = vpop.eup %2070  ;;  %v1833_v45 = vmul.f32 1.442695, %v1796_v20  ;;  %v907_v22 = vadd.f32 %v906_v36, %v839_v29 }
 0x138   : > { %1418 = vmatmul.f32.gmra.mxu2 %v2387_v7  ;;  %1888 = vst [vmem:[%s2662_s3 + $0x8] sm:$0xff] %v2071_v61 }
 0x139   : > { %v844_v6 = vpop.f32.mrf.mxu1  ;;  %2072 = vpow2.f32 %v1833_v45  ;;  %v959_v26 = vadd.f32 %v958_v11, %v907_v22 }
 0x13a   : > { %1498 = vmatmul.f32.gmra.mxu3 %v2349_v53  ;;  %v780_v47 = vpop.f32.mrf.mxu0 }
 0x13b   : > { %v910_v38 = vpop.f32.mrf.mxu2  ;;  %v1768_v57 = vmul.f32 %v959_v26, %v959_v26  ;;  %v781_v48 = vadd.f32 %v780_v47, %v722_v34 }
 0x13c   : > { %1350 = vmatmul.f32.gmra.mxu1 %v2349_v53 }
 0x13d   : > { %v962_v50 = vpop.f32.mrf.mxu3  ;;  %v1800_v17 = vsub.f32 0.0, %v1768_v57  ;;  %v845_v32 = vadd.f32 %v844_v6, %v781_v48  ;;  %1298 = vmatmul.f32.gmra.mxu0 %v2349_v53 }
 0x13f   : > { %v2073_v7 = vpop.eup %2072  ;;  %v1841_v2 = vmul.f32 1.442695, %v1800_v17  ;;  %v911_v35 = vadd.f32 %v910_v38, %v845_v32 }
 0x140   : > { %1426 = vmatmul.f32.gmra.mxu2 %v2407_v12  ;;  %1892 = vst [vmem:[%s2662_s3 + $0x28] sm:$0xff] %v2073_v7 }
 0x141   : > { %v850_v23 = vpop.f32.mrf.mxu1  ;;  %2074 = vpow2.f32 %v1841_v2  ;;  %v963_v51 = vadd.f32 %v962_v50, %v911_v35 }
 0x142   : > { %1502 = vmatmul.f32.gmra.mxu3 %v2372_v63  ;;  %v785_v3 = vpop.f32.mrf.mxu0 }
 0x143   : > { %v914_v18 = vpop.f32.mrf.mxu2  ;;  %v1772_v60 = vmul.f32 %v963_v51, %v963_v51  ;;  %v786_v5 = vadd.f32 %v785_v3, %v726_v37 }
 0x144   : > { %1354 = vmatmul.f32.gmra.mxu1 %v2372_v63 }
 0x145   : > { %v966_v1 = vpop.f32.mrf.mxu3  ;;  %v1804_v36 = vsub.f32 0.0, %v1772_v60  ;;  %v851_v46 = vadd.f32 %v850_v23, %v786_v5  ;;  %1302 = vmatmul.f32.gmra.mxu0 %v2372_v63 }
 0x147   : > { %v2075_v12 = vpop.eup %2074  ;;  %v1849_v14 = vmul.f32 1.442695, %v1804_v36  ;;  %v915_v11 = vadd.f32 %v914_v18, %v851_v46 }
 0x148   : > { %1434 = vmatmul.f32.gmra.mxu2 %v2425_v21  ;;  %1896 = vst [vmem:[%s2662_s3 + $0x48] sm:$0xff] %v2075_v12 }
 0x149   : > { %v856_v59 = vpop.f32.mrf.mxu1  ;;  %2076 = vpow2.f32 %v1849_v14  ;;  %v967_v20 = vadd.f32 %v966_v1, %v915_v11 }
 0x14a   : > { %1506 = vmatmul.f32.gmra.mxu3 %v2392_v9  ;;  %v790_v29 = vpop.f32.mrf.mxu0 }
 0x14b   : > { %v918_v61 = vpop.f32.mrf.mxu2  ;;  %v1776_v45 = vmul.f32 %v967_v20, %v967_v20  ;;  %v791_v22 = vadd.f32 %v790_v29, %v730_v58 }
 0x14c   : > { %1358 = vmatmul.f32.gmra.mxu1 %v2392_v9 }
 0x14d   : > { %v970_v6 = vpop.f32.mrf.mxu3  ;;  %v1808_v34 = vsub.f32 0.0, %v1776_v45  ;;  %v857_v26 = vadd.f32 %v856_v59, %v791_v22  ;;  %1306 = vmatmul.f32.gmra.mxu0 %v2392_v9 }
 0x14f   : > { %v2077_v21 = vpop.eup %2076  ;;  %v1857_v47 = vmul.f32 1.442695, %v1808_v34  ;;  %v919_v38 = vadd.f32 %v918_v61, %v857_v26  ;;  %v3053_v34 = vld [vmem:[#allocation6_spill] sm:$0xff]  ;;  %v3054_v26 = vld [vmem:[#allocation5_spill] sm:$0xff] }
 0x150   : > { %1442 = vmatmul.f32.gmra.mxu2 %v3048_v16  ;;  %1900 = vst [vmem:[%s2662_s3 + $0x68] sm:$0xff] %v2077_v21 }
 0x151   : > { %v862_v54 = vpop.f32.mrf.mxu1  ;;  %2078 = vpow2.f32 %v1857_v47  ;;  %v971_v57 = vadd.f32 %v970_v6, %v919_v38 }
 0x152   : > { %1510 = vmatmul.f32.gmra.mxu3 %v3046_v42  ;;  %v795_v48 = vpop.f32.mrf.mxu0 }
 0x153   : > { %v922_v50 = vpop.f32.mrf.mxu2  ;;  %v1780_v17 = vmul.f32 %v971_v57, %v971_v57  ;;  %v796_v32 = vadd.f32 %v795_v48, %v734_v0 }
 0x154   : > { %1362 = vmatmul.f32.gmra.mxu1 %v3046_v42 }
 0x155   : > { %v974_v7 = vpop.f32.mrf.mxu3  ;;  %v1812_v2 = vsub.f32 0.0, %v1780_v17  ;;  %v863_v35 = vadd.f32 %v862_v54, %v796_v32  ;;  %1310 = vmatmul.f32.gmra.mxu0 %v3046_v42 }
 0x157   : > { %v2079_v16 = vpop.eup %2078  ;;  %v1865_v23 = vmul.f32 1.442695, %v1812_v2  ;;  %v923_v37 = vadd.f32 %v922_v50, %v863_v35 }
 0x158   : > { %1450 = vmatmul.f32.gmra.mxu2 %v3052_v31  ;;  %1904 = vst [vmem:[%s2662_s3 + $0x88] sm:$0xff] %v2079_v16 }
 0x159   : > { %v868_v41 = vpop.f32.mrf.mxu1  ;;  %2080 = vpow2.f32 %v1865_v23  ;;  %v975_v51 = vadd.f32 %v974_v7, %v923_v37 }
 0x15a   : > { %1514 = vmatmul.f32.gmra.mxu3 %v3051_v24  ;;  %v800_v3 = vpop.f32.mrf.mxu0 }
 0x15b   : > { %v926_v18 = vpop.f32.mrf.mxu2  ;;  %v1784_v60 = vmul.f32 %v975_v51, %v975_v51  ;;  %v801_v5 = vadd.f32 %v800_v3, %v738_v44 }
 0x15c   : > { %1366 = vmatmul.f32.gmra.mxu1 %v3051_v24 }
 0x15d   : > { %v978_v1 = vpop.f32.mrf.mxu3  ;;  %v1816_v36 = vsub.f32 0.0, %v1784_v60  ;;  %v869_v46 = vadd.f32 %v868_v41, %v801_v5  ;;  %1314 = vmatmul.f32.gmra.mxu0 %v3051_v24 }
 0x15f   : > { %v2081_v31 = vpop.eup %2080  ;;  %v1873_v12 = vmul.f32 1.442695, %v1816_v36  ;;  %v927_v14 = vadd.f32 %v926_v18, %v869_v46 }
 0x160   : > { %1675 = vmatmul.f32.vlgmr.msrb.gmra.mxu2 %v2296_v27  ;;  %1908 = vst [vmem:[%s2662_s3 + $0xa8] sm:$0xff] %v2081_v31 }
 0x161   : > { %v2795_v10 = vpop.f32.mrf.mxu1  ;;  %2082 = vpow2.f32 %v1873_v12  ;;  %v979_v55 = vadd.f32 %v978_v1, %v927_v14 }
 0x162   : > { %1727 = vmatmul.f32.vlgmr.msrb.gmra.mxu3 %v2296_v27  ;;  %v2798_v11 = vpop.f32.mrf.mxu0 }
 0x163   : > { %v2800_v59 = vpop.f32.mrf.mxu2  ;;  %v1788_v58 = vmul.f32 %v979_v55, %v979_v55 }
 0x164   : > { %1603 = vmatmul.f32.vlgmr.msrb.gmra.mxu1 %v2316_v39 }
 0x165   : > { %v2803_v20 = vpop.f32.mrf.mxu3  ;;  %v1820_v29 = vsub.f32 0.0, %v1788_v58  ;;  %1542 = vmatmul.f32.vlgmr.msrb.gmra.mxu0 %v2306_v33 }
 0x167   : > { %v2083_v61 = vpop.eup %2082  ;;  %v1881_v45 = vmul.f32 1.442695, %v1820_v29 }
 0x168   : > { %1679 = vmatmul.f32.gmra.mxu2 %v2299_v28  ;;  %1912 = vst [vmem:[%s2662_s3 + $0xc8] sm:$0xff] %v2083_v61 }
 0x169   : > { %v1102_v22 = vpop.f32.mrf.mxu1  ;;  %2084 = vpow2.f32 %v1881_v45 }
 0x16a   : > { %1731 = vmatmul.f32.gmra.mxu3 %v2299_v28  ;;  %v1014_v27 = vpop.f32.mrf.mxu0 }
 0x16b   : > { %v2809_v6 = vpop.f32.mrf.mxu2  ;;  %v1103_v35 = vadd.f32 %v1102_v22, %v1014_v27 }
 0x16c   : > { %1609 = vmatmul.f32.gmra.mxu1 %v3053_v34 }
 0x16d   : > { %v2812_v39 = vpop.f32.mrf.mxu3  ;;  %1547 = vmatmul.f32.gmra.mxu0 %v3054_v26  ;;  %v1160_v41 = vadd.f32 %v2809_v6, %v1103_v35 }
 0x16f   : > { %v2085_v21 = vpop.eup %2084  ;;  %v1222_v3 = vadd.f32 %v2812_v39, %v1160_v41 }
 0x170   : > { %1683 = vmatmul.f32.gmra.mxu2 %v2324_v43  ;;  %1916 = vst [vmem:[%s2662_s3 + $0xe8] sm:$0xff] %v2085_v21 }
 0x171   : > { %v1106_v33 = vpop.f32.mrf.mxu1 }
 0x172   : > { %1735 = vmatmul.f32.gmra.mxu3 %v2324_v43  ;;  %v1022_v47 = vpop.f32.mrf.mxu0 }
 0x173   : > { %v2818_v38 = vpop.f32.mrf.mxu2  ;;  %v1107_v18 = vadd.f32 %v1106_v33, %v1022_v47 }
 0x174   : > { %1615 = vmatmul.f32.gmra.mxu1 %v2347_v52 }
 0x175   : > { %v2821_v28 = vpop.f32.mrf.mxu3  ;;  %1552 = vmatmul.f32.gmra.mxu0 %v2336_v49  ;;  %v1165_v31 = vadd.f32 %v2818_v38, %v1107_v18 }
 0x177   : > { %v1228_v55 = vadd.f32 %v2821_v28, %v1165_v31 }
 0x178   : > { %1687 = vmatmul.f32.gmra.mxu2 %v2349_v53 }
 0x179   : > { %v2825_v54 = vpop.f32.mrf.mxu1 }
 0x17a   : > { %1739 = vmatmul.f32.gmra.mxu3 %v2349_v53  ;;  %v2828_v0 = vpop.f32.mrf.mxu0 }
 0x17b   : > { %v2830_v57 = vpop.f32.mrf.mxu2 }
 0x17c   : > { %1621 = vmatmul.f32.gmra.mxu1 %v2370_v62 }
 0x17d   : > { %v2833_v43 = vpop.f32.mrf.mxu3  ;;  %1557 = vmatmul.f32.gmra.mxu0 %v2359_v56 }
 0x180   : > { %1691 = vmatmul.f32.gmra.mxu2 %v2372_v63 }
 0x181   : > { %v2837_v52 = vpop.f32.mrf.mxu1 }
 0x182   : > { %1743 = vmatmul.f32.gmra.mxu3 %v2372_v63  ;;  %v2840_v49 = vpop.f32.mrf.mxu0 }
 0x183   : > { %v2842_v48 = vpop.f32.mrf.mxu2  ;;  %v1115_v21 = vadd.f32 %v2837_v52, %v2840_v49 }
 0x184   : > { %1627 = vmatmul.f32.gmra.mxu1 %v2390_v8 }
 0x185   : > { %v2845_v53 = vpop.f32.mrf.mxu3  ;;  %1562 = vmatmul.f32.gmra.mxu0 %v2382_v4 }
 0x188   : > { %1695 = vmatmul.f32.gmra.mxu2 %v2392_v9 }
 0x189   : > { %v2849_v62 = vpop.f32.mrf.mxu1 }
 0x18a   : > { %1747 = vmatmul.f32.gmra.mxu3 %v2392_v9  ;;  %v2852_v56 = vpop.f32.mrf.mxu0 }
 0x18b   : > { %v2854_v50 = vpop.f32.mrf.mxu2  ;;  %v1119_v52 = vadd.f32 %v2849_v62, %v2852_v56 }
 0x18c   : > { %1633 = vmatmul.f32.gmra.mxu1 %v2410_v15 }
 0x18d   : > { %v2857_v63 = vpop.f32.mrf.mxu3  ;;  %1567 = vmatmul.f32.gmra.mxu0 %v2402_v13  ;;  %v1099_v13 = vadd.f32 %v2795_v10, %v2798_v11  ;;  %v1111_v11 = vadd.f32 %v2825_v54, %v2828_v0 }
 0x18f   : > { %v1155_v7 = vadd.f32 %v2800_v59, %v1099_v13  ;;  %v1170_v27 = vadd.f32 %v2830_v57, %v1111_v11  ;;  %v1175_v57 = vadd.f32 %v2842_v48, %v1115_v21  ;;  %v1180_v48 = vadd.f32 %v2854_v50, %v1119_v52 }
 0x190   : > { %1699 = vmatmul.f32.gmra.mxu2 %v3046_v42 }
 0x191   : > { %v2861_v8 = vpop.f32.mrf.mxu1  ;;  %v1216_v2 = vadd.f32 %v2803_v20, %v1155_v7  ;;  %v1234_v26 = vadd.f32 %v2833_v43, %v1170_v27  ;;  %v1246_v18 = vadd.f32 %v2857_v63, %v1180_v48 }
 0x192   : > { %1751 = vmatmul.f32.gmra.mxu3 %v3046_v42  ;;  %v2864_v4 = vpop.f32.mrf.mxu0 }
 0x193   : > { %v2866_v17 = vpop.f32.mrf.mxu2  ;;  %v1123_v62 = vadd.f32 %v2861_v8, %v2864_v4 }
 0x194   : > { %1639 = vmatmul.f32.gmra.mxu1 %v3045_v30 }
 0x195   : > { %v2869_v9 = vpop.f32.mrf.mxu3  ;;  %1572 = vmatmul.f32.gmra.mxu0 %v2420_v19  ;;  %v1185_v50 = vadd.f32 %v2866_v17, %v1123_v62 }
 0x198   : > { %1703 = vmatmul.f32.gmra.mxu2 %v3051_v24 }
 0x199   : > { %v2873_v15 = vpop.f32.mrf.mxu1 }
 0x19a   : > { %1755 = vmatmul.f32.gmra.mxu3 %v3051_v24  ;;  %v2878_v42 = vpop.f32.mrf.mxu0 }
 0x19b   : > { %v2880_v32 = vpop.f32.mrf.mxu2  ;;  %v1127_v8 = vadd.f32 %v2873_v15, %v2878_v42 }
 0x19c   : > { %1645 = vmatmul.f32.gmra.mxu1 %v3050_v40 }
 0x19d   : > { %v2883_v30 = vpop.f32.mrf.mxu3  ;;  %1577 = vmatmul.f32.gmra.mxu0 %v2437_v25  ;;  %v1190_v17 = vadd.f32 %v2880_v32, %v1127_v8 }
 0x1a1   : > { %v1339_v19 = vpop.f32.mrf.mxu1 }
 0x1a2   : > { %v1287_v16 = vpop.f32.mrf.mxu0 }
 0x1a3   : > { %v2888_v23 = vpop.f32.mrf.mxu2  ;;  %v1288_v24 = vadd.f32 %v1287_v16, %v1216_v2  ;;  %v1240_v2 = vadd.f32 %v2845_v53, %v1175_v57 }
 0x1a5   : > { %v2890_v37 = vpop.f32.mrf.mxu3  ;;  %v1340_v44 = vadd.f32 %v1339_v19, %v1288_v24 }
 0x1a7   : > { %v1761_v40 = vmul.f32 %v1340_v44, %v1340_v44 }
 0x1a9   : > { %v1343_v51 = vpop.f32.mrf.mxu1  ;;  %v1793_v60 = vsub.f32 0.0, %v1761_v40 }
 0x1aa   : > { %v1291_v25 = vpop.f32.mrf.mxu0 }
 0x1ab   : > { %v2894_v5 = vpop.f32.mrf.mxu2  ;;  %v1827_v1 = vmul.f32 1.442695, %v1793_v60  ;;  %v1292_v36 = vadd.f32 %v1291_v25, %v1222_v3 }
 0x1ad   : > { %v2896_v46 = vpop.f32.mrf.mxu3  ;;  %2086 = vpow2.f32 %v1827_v1  ;;  %v1344_v12 = vadd.f32 %v1343_v51, %v1292_v36 }
 0x1af   : > { %v1765_v14 = vmul.f32 %v1344_v12, %v1344_v12 }
 0x1b1   : > { %v1347_v10 = vpop.f32.mrf.mxu1  ;;  %v1797_v59 = vsub.f32 0.0, %v1765_v14 }
 0x1b2   : > { %v1295_v58 = vpop.f32.mrf.mxu0 }
 0x1b3   : > { %v2902_v20 = vpop.f32.mrf.mxu2  ;;  %v2087_v29 = vpop.eup %2086  ;;  %v1835_v61 = vmul.f32 1.442695, %v1797_v59  ;;  %v1296_v45 = vadd.f32 %v1295_v58, %v1228_v55  ;;  %v1252_v55 = vadd.f32 %v2869_v9, %v1185_v50 }
 0x1b4   : > { %1889 = vst [vmem:[%s2662_s3 + $0x10] sm:$0xff] %v2087_v29 }
 0x1b5   : > { %v2905_v22 = vpop.f32.mrf.mxu3  ;;  %2088 = vpow2.f32 %v1835_v61  ;;  %v1348_v6 = vadd.f32 %v1347_v10, %v1296_v45 }
 0x1b7   : > { %v1769_v34 = vmul.f32 %v1348_v6, %v1348_v6 }
 0x1b9   : > { %v1351_v39 = vpop.f32.mrf.mxu1  ;;  %v1801_v33 = vsub.f32 0.0, %v1769_v34  ;;  %v1258_v34 = vadd.f32 %v2883_v30, %v1190_v17 }
 0x1ba   : > { %v1299_v47 = vpop.f32.mrf.mxu0 }
 0x1bb   : > { %v2911_v38 = vpop.f32.mrf.mxu2  ;;  %v2089_v28 = vpop.eup %2088  ;;  %v1843_v54 = vmul.f32 1.442695, %v1801_v33  ;;  %v1300_v0 = vadd.f32 %v1299_v47, %v1234_v26 }
 0x1bc   : > { %1893 = vst [vmem:[%s2662_s3 + $0x30] sm:$0xff] %v2089_v28 }
 0x1bd   : > { %v2914_v13 = vpop.f32.mrf.mxu3  ;;  %2090 = vpow2.f32 %v1843_v54  ;;  %v1352_v7 = vadd.f32 %v1351_v39, %v1300_v0  ;;  %v1488_v0 = vadd.f32 %v2890_v37, %v2888_v23 }
 0x1bf   : > { %v1773_v19 = vmul.f32 %v1352_v7, %v1352_v7 }
 0x1c1   : > { %v1355_v43 = vpop.f32.mrf.mxu1  ;;  %v1805_v49 = vsub.f32 0.0, %v1773_v19 }
 0x1c2   : > { %v1303_v35 = vpop.f32.mrf.mxu0 }
 0x1c3   : > { %v2920_v16 = vpop.f32.mrf.mxu2  ;;  %v2091_v24 = vpop.eup %2090  ;;  %v1851_v41 = vmul.f32 1.442695, %v1805_v49  ;;  %v1304_v44 = vadd.f32 %v1303_v35, %v1240_v2 }
 0x1c4   : > { %1897 = vst [vmem:[%s2662_s3 + $0x50] sm:$0xff] %v2091_v24 }
 0x1c5   : > { %v2923_v40 = vpop.f32.mrf.mxu3  ;;  %2092 = vpow2.f32 %v1851_v41  ;;  %v1356_v51 = vadd.f32 %v1355_v43, %v1304_v44  ;;  %v1492_v41 = vadd.f32 %v2896_v46, %v2894_v5 }
 0x1c7   : > { %v1777_v3 = vmul.f32 %v1356_v51, %v1356_v51 }
 0x1c9   : > { %v1359_v53 = vpop.f32.mrf.mxu1  ;;  %v1809_v56 = vsub.f32 0.0, %v1777_v3 }
 0x1ca   : > { %v1307_v60 = vpop.f32.mrf.mxu0 }
 0x1cb   : > { %v2929_v25 = vpop.f32.mrf.mxu2  ;;  %v2093_v1 = vpop.eup %2092  ;;  %v1859_v36 = vmul.f32 1.442695, %v1809_v56  ;;  %v1308_v31 = vadd.f32 %v1307_v60, %v1246_v18 }
 0x1cc   : > { %1901 = vst [vmem:[%s2662_s3 + $0x70] sm:$0xff] %v2093_v1 }
 0x1cd   : > { %v2932_v12 = vpop.f32.mrf.mxu3  ;;  %2094 = vpow2.f32 %v1859_v36  ;;  %v1360_v14 = vadd.f32 %v1359_v53, %v1308_v31  ;;  %v1496_v36 = vadd.f32 %v2905_v22, %v2902_v20 }
 0x1cf   : > { %v1781_v10 = vmul.f32 %v1360_v14, %v1360_v14 }
 0x1d1   : > { %v1363_v63 = vpop.f32.mrf.mxu1  ;;  %v1813_v4 = vsub.f32 0.0, %v1781_v10 }
 0x1d2   : > { %v1311_v11 = vpop.f32.mrf.mxu0 }
 0x1d3   : > { %v2938_v59 = vpop.f32.mrf.mxu2  ;;  %v2095_v58 = vpop.eup %2094  ;;  %v1867_v29 = vmul.f32 1.442695, %v1813_v4  ;;  %v1312_v61 = vadd.f32 %v1311_v11, %v1252_v55 }
 0x1d4   : > { %1905 = vst [vmem:[%s2662_s3 + $0x90] sm:$0xff] %v2095_v58 }
 0x1d5   : > { %v2941_v45 = vpop.f32.mrf.mxu3  ;;  %2096 = vpow2.f32 %v1867_v29  ;;  %v1364_v27 = vadd.f32 %v1363_v63, %v1312_v61  ;;  %v1500_v29 = vadd.f32 %v2914_v13, %v2911_v38 }
 0x1d7   : > { %v1785_v6 = vmul.f32 %v1364_v27, %v1364_v27 }
 0x1d9   : > { %v1367_v9 = vpop.f32.mrf.mxu1  ;;  %v1817_v15 = vsub.f32 0.0, %v1785_v6 }
 0x1da   : > { %v1315_v42 = vpop.f32.mrf.mxu0 }
 0x1db   : > { %v2945_v39 = vpop.f32.mrf.mxu2  ;;  %v2097_v26 = vpop.eup %2096  ;;  %v1875_v21 = vmul.f32 1.442695, %v1817_v15  ;;  %v1316_v33 = vadd.f32 %v1315_v42, %v1258_v34 }
 0x1dc   : > { %1909 = vst [vmem:[%s2662_s3 + $0xb0] sm:$0xff] %v2097_v26 }
 0x1dd   : > { %v2948_v47 = vpop.f32.mrf.mxu3  ;;  %2098 = vpow2.f32 %v1875_v21  ;;  %v1368_v28 = vadd.f32 %v1367_v9, %v1316_v33  ;;  %v1504_v33 = vadd.f32 %v2923_v40, %v2920_v16 }
 0x1df   : > { %v1789_v32 = vmul.f32 %v1368_v28, %v1368_v28 }
 0x1e1   : > { %v1604_v54 = vpop.f32.mrf.mxu1  ;;  %v1821_v57 = vsub.f32 0.0, %v1789_v32 }
 0x1e2   : > { %v1543_v30 = vpop.f32.mrf.mxu0 }
 0x1e3   : > { %v1676_v7 = vpop.f32.mrf.mxu2  ;;  %v2099_v19 = vpop.eup %2098  ;;  %v1883_v43 = vmul.f32 1.442695, %v1821_v57  ;;  %v1544_v2 = vadd.f32 %v1543_v30, %v1488_v0 }
 0x1e4   : > { %1913 = vst [vmem:[%s2662_s3 + $0xd0] sm:$0xff] %v2099_v19 }
 0x1e5   : > { %v1728_v52 = vpop.f32.mrf.mxu3  ;;  %2100 = vpow2.f32 %v1883_v43  ;;  %v1605_v49 = vadd.f32 %v1604_v54, %v1544_v2 }
 0x1e7   : > { %v1677_v35 = vadd.f32 %v1676_v7, %v1605_v49 }
 0x1e9   : > { %v1610_v24 = vpop.f32.mrf.mxu1  ;;  %v1729_v44 = vadd.f32 %v1728_v52, %v1677_v35  ;;  %v1508_v52 = vadd.f32 %v2932_v12, %v2929_v25 }
 0x1ea   : > { %v1548_v48 = vpop.f32.mrf.mxu0 }
 0x1eb   : > { %v1680_v51 = vpop.f32.mrf.mxu2  ;;  %v2101_v23 = vpop.eup %2100  ;;  %v1762_v37 = vmul.f32 %v1729_v44, %v1729_v44  ;;  %v1549_v3 = vadd.f32 %v1548_v48, %v1492_v41 }
 0x1ec   : > { %1917 = vst [vmem:[%s2662_s3 + $0xf0] sm:$0xff] %v2101_v23 }
 0x1ed   : > { %v1732_v53 = vpop.f32.mrf.mxu3  ;;  %v1794_v18 = vsub.f32 0.0, %v1762_v37  ;;  %v1611_v62 = vadd.f32 %v1610_v24, %v1549_v3 }
 0x1ef   : > { %v1829_v56 = vmul.f32 1.442695, %v1794_v18  ;;  %v1681_v60 = vadd.f32 %v1680_v51, %v1611_v62 }
 0x1f1   : > { %v1616_v1 = vpop.f32.mrf.mxu1  ;;  %2102 = vpow2.f32 %v1829_v56  ;;  %v1733_v31 = vadd.f32 %v1732_v53, %v1681_v60  ;;  %v1512_v53 = vadd.f32 %v2941_v45, %v2938_v59 }
 0x1f2   : > { %v1553_v5 = vpop.f32.mrf.mxu0 }
 0x1f3   : > { %v1684_v46 = vpop.f32.mrf.mxu2  ;;  %v1766_v50 = vmul.f32 %v1733_v31, %v1733_v31  ;;  %v1554_v14 = vadd.f32 %v1553_v5, %v1496_v36 }
 0x1f5   : > { %v1736_v10 = vpop.f32.mrf.mxu3  ;;  %v1798_v63 = vsub.f32 0.0, %v1766_v50  ;;  %v1617_v55 = vadd.f32 %v1616_v1, %v1554_v14  ;;  %v1516_v50 = vadd.f32 %v2948_v47, %v2945_v39 }
 0x1f7   : > { %v2103_v8 = vpop.eup %2102  ;;  %v1837_v4 = vmul.f32 1.442695, %v1798_v63  ;;  %v1685_v11 = vadd.f32 %v1684_v46, %v1617_v55 }
 0x1f8   : > { %1890 = vst [vmem:[%s2662_s3 + $0x18] sm:$0xff] %v2103_v8 }
 0x1f9   : > { %v1622_v58 = vpop.f32.mrf.mxu1  ;;  %2104 = vpow2.f32 %v1837_v4  ;;  %v1737_v20 = vadd.f32 %v1736_v10, %v1685_v11 }
 0x1fa   : > { %v1558_v22 = vpop.f32.mrf.mxu0 }
 0x1fb   : > { %v1688_v61 = vpop.f32.mrf.mxu2  ;;  %v1770_v17 = vmul.f32 %v1737_v20, %v1737_v20  ;;  %v1559_v27 = vadd.f32 %v1558_v22, %v1500_v29 }
 0x1fd   : > { %v1740_v6 = vpop.f32.mrf.mxu3  ;;  %v1802_v9 = vsub.f32 0.0, %v1770_v17  ;;  %v1623_v34 = vadd.f32 %v1622_v58, %v1559_v27 }
 0x1ff   : > { %v2105_v15 = vpop.eup %2104  ;;  %v1845_v42 = vmul.f32 1.442695, %v1802_v9  ;;  %v1689_v26 = vadd.f32 %v1688_v61, %v1623_v34 }
 0x200   : > { %1894 = vst [vmem:[%s2662_s3 + $0x38] sm:$0xff] %v2105_v15 }
 0x201   : > { %v1628_v21 = vpop.f32.mrf.mxu1  ;;  %2106 = vpow2.f32 %v1845_v42  ;;  %v1741_v38 = vadd.f32 %v1740_v6, %v1689_v26 }
 0x202   : > { %v1563_v13 = vpop.f32.mrf.mxu0 }
 0x203   : > { %v1692_v28 = vpop.f32.mrf.mxu2  ;;  %v1774_v32 = vmul.f32 %v1741_v38, %v1741_v38  ;;  %v1564_v54 = vadd.f32 %v1563_v13, %v1504_v33 }
 0x205   : > { %v1744_v0 = vpop.f32.mrf.mxu3  ;;  %v1806_v57 = vsub.f32 0.0, %v1774_v32  ;;  %v1629_v30 = vadd.f32 %v1628_v21, %v1564_v54 }
 0x207   : > { %v2107_v7 = vpop.eup %2106  ;;  %v1853_v19 = vmul.f32 1.442695, %v1806_v57  ;;  %v1693_v43 = vadd.f32 %v1692_v28, %v1629_v30 }
 0x208   : > { %1898 = vst [vmem:[%s2662_s3 + $0x58] sm:$0xff] %v2107_v7 }
 0x209   : > { %v1634_v2 = vpop.f32.mrf.mxu1  ;;  %2108 = vpow2.f32 %v1853_v19  ;;  %v1745_v16 = vadd.f32 %v1744_v0, %v1693_v43 }
 0x20a   : > { %v1568_v40 = vpop.f32.mrf.mxu0 }
 0x20b   : > { %v1696_v49 = vpop.f32.mrf.mxu2  ;;  %v1778_v35 = vmul.f32 %v1745_v16, %v1745_v16  ;;  %v1569_v24 = vadd.f32 %v1568_v40, %v1508_v52 }
 0x20d   : > { %v1748_v41 = vpop.f32.mrf.mxu3  ;;  %v1810_v44 = vsub.f32 0.0, %v1778_v35  ;;  %v1635_v48 = vadd.f32 %v1634_v2, %v1569_v24 }
 0x20f   : > { %v2109_v51 = vpop.eup %2108  ;;  %v1861_v23 = vmul.f32 1.442695, %v1810_v44  ;;  %v1697_v37 = vadd.f32 %v1696_v49, %v1635_v48 }
 0x210   : > { %1902 = vst [vmem:[%s2662_s3 + $0x78] sm:$0xff] %v2109_v51 }
 0x211   : > { %v1640_v3 = vpop.f32.mrf.mxu1  ;;  %2110 = vpow2.f32 %v1861_v23  ;;  %v1749_v25 = vadd.f32 %v1748_v41, %v1697_v37 }
 0x212   : > { %v1573_v12 = vpop.f32.mrf.mxu0 }
 0x213   : > { %v1700_v18 = vpop.f32.mrf.mxu2  ;;  %v1782_v62 = vmul.f32 %v1749_v25, %v1749_v25  ;;  %v1574_v56 = vadd.f32 %v1573_v12, %v1512_v53 }
 0x215   : > { %v1752_v60 = vpop.f32.mrf.mxu3  ;;  %v1814_v1 = vsub.f32 0.0, %v1782_v62  ;;  %v1641_v36 = vadd.f32 %v1640_v3, %v1574_v56 }
 0x217   : > { %v2111_v31 = vpop.eup %2110  ;;  %v1869_v5 = vmul.f32 1.442695, %v1814_v1  ;;  %v1701_v46 = vadd.f32 %v1700_v18, %v1641_v36 }
 0x218   : > { %1906 = vst [vmem:[%s2662_s3 + $0x98] sm:$0xff] %v2111_v31 }
 0x219   : > { %2112 = vpow2.f32 %v1869_v5  ;;  %v1753_v14 = vadd.f32 %v1752_v60, %v1701_v46  ;;  %v1646_v45 = vpop.f32.mrf.mxu1 }
 0x21a   : > { %v1578_v59 = vpop.f32.mrf.mxu0 }
 0x21b   : > { %v1786_v10 = vmul.f32 %v1753_v14, %v1753_v14  ;;  %v1579_v63 = vadd.f32 %v1578_v59, %v1516_v50  ;;  %v1704_v55 = vpop.f32.mrf.mxu2 }
 0x21d   : > { %v1818_v8 = vsub.f32 0.0, %v1786_v10  ;;  %v1647_v4 = vadd.f32 %v1646_v45, %v1579_v63  ;;  %v1756_v11 = vpop.f32.mrf.mxu3 }
 0x21f   : > { %v2113_v58 = vpop.eup %2112  ;;  %v1877_v29 = vmul.f32 1.442695, %v1818_v8  ;;  %v1705_v20 = vadd.f32 %v1704_v55, %v1647_v4 }
 0x220   : > { %1910 = vst [vmem:[%s2662_s3 + $0xb8] sm:$0xff] %v2113_v58 }
 0x221   : > { %2114 = vpow2.f32 %v1877_v29  ;;  %v1757_v39 = vadd.f32 %v1756_v11, %v1705_v20 }
 0x223   : > { %v1790_v47 = vmul.f32 %v1757_v39, %v1757_v39 }
 0x225   : > { %v1822_v22 = vsub.f32 0.0, %v1790_v47 }
 0x227   : > { %v2115_v61 = vpop.eup %2114  ;;  %v1885_v17 = vmul.f32 1.442695, %v1822_v22 }
 0x228   : > { %1914 = vst [vmem:[%s2662_s3 + $0xd8] sm:$0xff] %v2115_v61 }
 0x229   : > { %2116 = vpow2.f32 %v1885_v17 }
 0x22f   : > { %v2117_v27 = vpop.eup %2116 }
 0x230   : > { %1918 = vst [vmem:[%s2662_s3 + $0xf8] sm:$0xff] %v2117_v27 }
 0x231   : > { %2145 = shalt.err (!%p2142_p3)
}
 0x232   : > { %s2182_s28 = smov 512   ;;  %s2183_s29 = smov 32  }
 0x233   : > { %2013 = dma.vmem_to_hbm [thread:$0]  (%p2237_p5), %s1934_s16, 4096, %s1936_s17, %s1920_s21, %s2182_s28, %s2182_s28, %s2183_s29  }
 0x234 PF: > { %p2019_p4 = scmp.ge.s32.totalorder %s2180_s12, 2  ;;  %s1950_s30 = sand.u32 1, %s2168_s9  }
 0x235   : > { %s1951_s3 = scalar_lea.sflag [#allocation3], %s1950_s30 }
 0x236   : > { %p2016_p7 = pnand %p2019_p4, %p2241_p6 }
 0x238   : > { %p2017_p8 = pneg %p2016_p7 }
 0x23a   : > { %2163 = dma.done.wait (%p2017_p8), %s1951_s3, 4096  }
 0x23b   : > { %2165 = vsyncadd (%p2017_p8), %s1951_s3, 4294963200  ;;  %p12_p9 = scmp.ge.s32.totalorder %s2224_s15, 4   ;;  %s3055_s9 = smov %s2172_s10 }
 0x23c   : > { %s3056_s10 = smov %s2176_s11  ;;  %s3057_s11 = smov %s2235_s18 }
 0x23d   : > { %s3058_s12 = smov %s2224_s15  ;;  %14 = sbr.rel (!%p12_p9) target bundleno = 3 (0x3), region = 63 }
 0x242   :  { %1957 = vsyncpa [#allocation3], 1 }
 0x243   :  { %1959 = vsyncpa [#allocation3 + $0x1], 1 }

</bundles_post_ra>
